<compile_context>
chip_gen: v7x
topology: tpu7x:2x2x1
jax: 0.10.0
libtpu: 0.0.40
codegen_flags: <defaults>
</compile_context>

<pallas_src>
import functools

import numpy as np
import jax
import jax.numpy as jnp
from jax.experimental import pallas as pl
from jax.experimental.pallas import tpu as pltpu

LRELU_SLOPE = 0.1
SINE_AMP = 0.1
NOISE_STD = 0.003
VOICED_THRESHOLD = 0.0

MAX_TILE_T = 1024                     # lane-dense output tile (v7x VMEM-safe)
VMEM_LIMIT = 48 * 1024 * 1024


def _round_up(a, m):
    return -(-a // m) * m


# ----------------------------------------------------------------------------
# Generic tiled conv1d kernel (stride 1, arbitrary dilation, P output phases)
# ----------------------------------------------------------------------------
def _conv_kernel(*refs, K, dilation, P, tile_t, fold, pre_slope, post_op,
                 has_halo, has_residual):
    idx = 0
    x_ref = refs[idx]; idx += 1
    hx_ref = None
    if has_halo:
        hx_ref = refs[idx]; idx += 1
    w_ref = refs[idx]; idx += 1
    b_ref = refs[idx]; idx += 1
    res_ref = None
    if has_residual:
        res_ref = refs[idx]; idx += 1
    o_ref = refs[idx]

    x = x_ref[...]                                         # (C_in, tile+halo)
    if has_halo:
        x = jnp.concatenate([x, hx_ref[...]], axis=-1)
    if pre_slope is not None:                              # fused leaky-ReLU
        xf = x.astype(jnp.float32)
        x = jnp.where(xf >= 0, xf, pre_slope * xf).astype(jnp.bfloat16)

    if fold:
        if K == 1:
            patch = x[:, :tile_t]
        else:
            # fold the K taps into the contraction: (K*C_in, tile_t)
            patch = jnp.concatenate(
                [x[:, k * dilation:k * dilation + tile_t] for k in range(K)],
                axis=0)

    for r in range(P):                                     # unrolled phases
        if fold:
            acc = jnp.dot(w_ref[r], patch,
                          preferred_element_type=jnp.float32)
        else:
            acc = jnp.dot(w_ref[r, 0], x[:, :tile_t],
                          preferred_element_type=jnp.float32)
            for k in range(1, K):
                acc = acc + jnp.dot(
                    w_ref[r, k], x[:, k * dilation:k * dilation + tile_t],
                    preferred_element_type=jnp.float32)
        acc = acc + b_ref[r]                               # (C_out, 1) bcast
        if has_residual:
            acc = acc + res_ref[...].astype(jnp.float32)
        if post_op == "tanh":
            acc = jnp.tanh(acc)
        o_ref[r] = acc.astype(o_ref.dtype)


def run_conv(op, x, out_len, *, pre_slope=None, post_op=None, residual=None,
             out_dtype=jnp.bfloat16):
    """Time-tiled stride-1 conv.  x: (B, C_in, T).

    Returns (B, C_out, out_len) when op["P"] == 1, else (B, P, C_out, out_len).
    """
    K, dil, P = op["K"], op["dilation"], op["P"]
    C_out, fold, lpad = op["C_out"], op["fold"], op["lpad"]
    B, C_in, T = x.shape
    halo = (K - 1) * dil

    if out_len <= MAX_TILE_T:
        # short time axis: one exact block per batch element
        tile_t, has_halo, halo_blk, n_t = out_len, False, 0, 1
        T_pad = out_len + halo
    else:
        tile_t = MAX_TILE_T
        has_halo = halo > 0
        halo_blk = _round_up(halo, 128) if has_halo else 0
        if has_halo and tile_t % halo_blk:
            tile_t = _round_up(tile_t, halo_blk)
        n_t = -(-out_len // tile_t)
        T_pad = n_t * tile_t + halo_blk
    out_alloc = n_t * tile_t

    pad_r = T_pad - lpad - T
    assert pad_r >= 0 and halo <= max(halo_blk, T_pad - tile_t if n_t == 1 else halo_blk)
    xp = jnp.pad(x.astype(jnp.bfloat16), ((0, 0), (0, 0), (lpad, pad_r)))

    kern = functools.partial(
        _conv_kernel, K=K, dilation=dil, P=P, tile_t=tile_t, fold=fold,
        pre_slope=pre_slope, post_op=post_op, has_halo=has_halo,
        has_residual=residual is not None)

    in_specs = [pl.BlockSpec((None, C_in, T_pad if n_t == 1 else tile_t),
                             lambda b, t: (b, 0, t))]
    inputs = [xp]
    if has_halo:
        r_blk = tile_t // halo_blk
        in_specs.append(pl.BlockSpec((None, C_in, halo_blk),
                                     lambda b, t: (b, 0, (t + 1) * r_blk)))
        inputs.append(xp)
    w, bias = op["w"], op["b"]
    in_specs.append(pl.BlockSpec(w.shape, lambda b, t: (0,) * w.ndim))
    inputs.append(w)
    in_specs.append(pl.BlockSpec(bias.shape, lambda b, t: (0, 0, 0)))
    inputs.append(bias)
    if residual is not None:
        assert residual.shape == (B, C_out, out_len)
        res = residual.astype(jnp.bfloat16)
        if out_alloc != out_len:
            res = jnp.pad(res, ((0, 0), (0, 0), (0, out_alloc - out_len)))
        in_specs.append(pl.BlockSpec((None, C_out, tile_t),
                                     lambda b, t: (b, 0, t)))
        inputs.append(res)

    out = pl.pallas_call(
        kern,
        out_shape=jax.ShapeDtypeStruct((B, P, C_out, out_alloc), out_dtype),
        grid=(B, n_t),
        in_specs=in_specs,
        out_specs=pl.BlockSpec((None, P, C_out, tile_t),
                               lambda b, t: (b, 0, 0, t)),
        compiler_params=pltpu.CompilerParams(
            dimension_semantics=("parallel", "parallel"),
            vmem_limit_bytes=VMEM_LIMIT),
    )(*inputs)
    if out_alloc != out_len:
        out = out[..., :out_len]
    if P == 1:
        out = out[:, 0]
    return out


def run_conv_transpose(op, x, *, pre_slope=None):
    """Polyphase ConvTranspose1d.  x: (B, C_in, T) -> (B, C_out, T_out)."""
    B, _, T = x.shape
    u = op["stride"]
    T_out = (T - 1) * u - 2 * op["padding"] + op["K_orig"] + op["output_padding"]
    Q = -(-T_out // u)
    ph = run_conv(op, x, Q, pre_slope=pre_slope)           # (B, u, C_out, Q)
    out = jnp.transpose(ph, (0, 2, 3, 1)).reshape(B, op["C_out"], Q * u)
    return out[:, :, :T_out]


def run_noise_conv(op, har):
    """Strided Conv1d(1, C, k) over the harmonic source, via light im2col."""
    s = op["stride"]
    B, _, Tf = har.shape
    if s == 1:                                             # last stage: k = 1
        return run_conv(op, har, Tf)
    K0, pad = op["K_orig"], op["padding"]
    T_out = (Tf + 2 * pad - K0) // s + 1
    if K0 == 2 * s and pad == s // 2 and s % 2 == 0 and Tf % s == 0:
        # standard NSF noise conv: each window = two adjacent s-blocks
        hp = jnp.pad(har, ((0, 0), (0, 0), (pad, pad)))    # (B, 1, Tf + s)
        blk = hp.reshape(B, T_out + 1, s)
        cols = jnp.concatenate([blk[:, :T_out, :], blk[:, 1:, :]], axis=-1)
        cols = jnp.transpose(cols, (0, 2, 1))              # (B, 2s, T_out)
    else:
        hp = jnp.pad(har, ((0, 0), (0, 0), (pad, pad)))
        cols = jnp.stack(
            [hp[:, 0, k: k + (T_out - 1) * s + 1: s] for k in range(K0)],
            axis=1)                                        # (B, K0, T_out)
    return run_conv(op, cols, T_out)


# ----------------------------------------------------------------------------
# Parameter init / packing into kernel-ready layouts (done once)
# ----------------------------------------------------------------------------
def _uniform(key, shape, scale):
    return jax.random.uniform(key, shape, jnp.float32, -scale, scale)


def _pack_conv_op(w, b, *, dilation=1, lpad=0, extra=None):
    """w: (C_out, C_in, K) torch Conv1d layout -> kernel-ready op dict."""
    C_out, C_in, K = w.shape
    fold = (K == 1) or (C_in % 16 == 0)        # bf16 sublane pack = 16
    if fold:
        wk = jnp.transpose(w, (0, 2, 1)).reshape(1, C_out, K * C_in)
    else:
        wk = jnp.transpose(w, (2, 0, 1))[None]             # (1, K, C_out, C_in)
    op = dict(w=wk.astype(jnp.bfloat16),
              b=b.reshape(1, C_out, 1).astype(jnp.float32),
              K=K, dilation=dilation, lpad=lpad, P=1, C_out=C_out, fold=fold)
    if extra:
        op.update(extra)
    return op


def _pack_convT_op(w, b, *, stride, padding, output_padding):
    """w: (C_in, C_out, K) torch ConvTranspose1d layout -> polyphase op."""
    C_in, C_out, K = w.shape
    u, p = stride, padding
    L = (K - 1 - p) // u                                   # left look-back
    E = L + (u - 1 + p) // u + 1                           # unified taps/phase
    kidx = np.arange(u)[:, None] + p + (L - np.arange(E))[None, :] * u
    valid = (kidx >= 0) & (kidx <= K - 1)
    Wg = w[:, :, np.clip(kidx, 0, K - 1)]                  # (C_in, C_out, u, E)
    Wg = jnp.where(jnp.asarray(valid)[None, None, :, :], Wg, 0.0)
    Wt = jnp.transpose(Wg, (2, 3, 1, 0))                   # (u, E, C_out, C_in)
    fold = (E == 1) or (C_in % 16 == 0)
    if fold:
        wk = jnp.transpose(Wt, (0, 2, 1, 3)).reshape(u, C_out, E * C_in)
    else:
        wk = Wt
    return dict(w=wk.astype(jnp.bfloat16),
                b=jnp.tile(b.reshape(1, C_out, 1), (u, 1, 1)).astype(jnp.float32),
                K=E, dilation=1, lpad=L, P=u, C_out=C_out, fold=fold,
                stride=u, padding=p, output_padding=output_padding, K_orig=K)


def init_params(cfg, key):
    keys = iter(jax.random.split(key, 256))
    uic = cfg["upsample_initial_channel"]
    rates, up_ks = cfg["upsample_rates"], cfg["upsample_kernel_sizes"]
    rb_ks, rb_ds = cfg["resblock_kernel_sizes"], cfg["resblock_dilations"]

    def conv_init(c_out, c_in, k, **pack_kw):
        kw_, kb_ = jax.random.split(next(keys))
        s = 1.0 / np.sqrt(c_in * k)
        return _pack_conv_op(_uniform(kw_, (c_out, c_in, k), s),
                             _uniform(kb_, (c_out,), s), **pack_kw)

    p = {"conv_pre": conv_init(uic, cfg["in_channel"], 7, lpad=3),
         "upsamples": [], "noise_convs": [], "mrfs": []}

    for i, (u, k) in enumerate(zip(rates, up_ks)):
        c_in = uic // (2 ** i)
        c_out = uic // (2 ** (i + 1))
        kw_, kb_ = jax.random.split(next(keys))
        s = 1.0 / np.sqrt(c_out * k)
        p["upsamples"].append(_pack_convT_op(
            _uniform(kw_, (c_in, c_out, k), s), _uniform(kb_, (c_out,), s),
            stride=u, padding=u // 2 + u % 2, output_padding=u % 2))

        if i < len(rates) - 1:
            s_f0 = int(np.prod(rates[i + 1:]))
            kn, pn = 2 * s_f0, s_f0 // 2
        else:
            s_f0, kn, pn = 1, 1, 0
        kw_, kb_ = jax.random.split(next(keys))
        sn = 1.0 / np.sqrt(kn)
        wn = _uniform(kw_, (c_out, 1, kn), sn)
        bn = _uniform(kb_, (c_out,), sn)
        # packed in im2col form: C_in = kn taps, kernel size 1
        p["noise_convs"].append(_pack_conv_op(
            jnp.transpose(wn, (0, 2, 1)), bn,
            extra=dict(stride=s_f0, K_orig=kn, padding=pn)))

        blocks = []
        for ks, ds in zip(rb_ks, rb_ds):
            convs1 = [conv_init(c_out, c_out, ks, dilation=d,
                                lpad=d * (ks - 1) // 2) for d in ds]
            convs2 = [conv_init(c_out, c_out, ks, dilation=1,
                                lpad=(ks - 1) // 2) for _ in ds]
            blocks.append({"convs1": convs1, "convs2": convs2})
        p["mrfs"].append(blocks)

    p["conv_post"] = conv_init(1, uic // (2 ** len(rates)), 7, lpad=3)

    hnum = cfg["harmonic_num"]
    kw_, kb_ = jax.random.split(next(keys))
    s = 1.0 / np.sqrt(hnum + 1)
    p["m_source"] = _pack_conv_op(_uniform(kw_, (1, hnum + 1, 1), s),
                                  _uniform(kb_, (1,), s))
    return p


# ----------------------------------------------------------------------------
# Model forward
# ----------------------------------------------------------------------------
def source_module_hn_nsf(ms_op, cfg, f0_btc, key):
    """f0_btc: (B, T_full, 1) -> harmonic source (B, 1, T_full)."""
    sr = cfg["sample_rate"]
    hnum = cfg["harmonic_num"]
    harmonics = jnp.arange(1, hnum + 2, dtype=jnp.float32)
    fn = f0_btc * harmonics[None, None, :]                 # (B, T, H+1)
    rad = (fn / sr) % 1.0
    # TODO(synk): SineGen's random per-harmonic initial phase (torch.rand) is
    # omitted; deterministic zero phase.  Phase cumsum kept in f32.
    phase = 2.0 * jnp.pi * jnp.cumsum(rad, axis=1)
    sines = SINE_AMP * jnp.sin(phase)
    uv = (f0_btc > VOICED_THRESHOLD).astype(jnp.float32)
    noise_amp = uv * NOISE_STD + (1.0 - uv) * SINE_AMP / 3.0
    noise = noise_amp * jax.random.normal(key, sines.shape, jnp.float32)
    sine_waves = sines * uv + noise                        # (B, T, H+1)
    x = jnp.transpose(sine_waves, (0, 2, 1))               # (B, H+1, T)
    # Linear(H+1 -> 1) + tanh fused into a kernel-size-1 conv
    return run_conv(ms_op, x, x.shape[-1], post_op="tanh")  # (B, 1, T)


def mrf_block_forward(block, x):
    """HiFiGAN ResBlock: (lrelu -> dilated conv -> lrelu -> conv) + residual,
    with the residual add fused into the second conv's kernel."""
    for op1, op2 in zip(block["convs1"], block["convs2"]):
        xt = run_conv(op1, x, x.shape[-1], pre_slope=LRELU_SLOPE)
        x = run_conv(op2, xt, x.shape[-1], pre_slope=LRELU_SLOPE, residual=x)
    return x


def f0_aware_hifigan_forward(params, cfg, x, f0, noise_key):
    rates = cfg["upsample_rates"]
    num_kernels = len(cfg["resblock_kernel_sizes"])
    total_up = int(np.prod(rates))

    # nn.Upsample(scale_factor=prod(rates), mode='nearest')
    f0_up = jnp.repeat(f0[:, None, :], total_up, axis=-1)  # (B, 1, T0*up)
    f0_btc = jnp.transpose(f0_up, (0, 2, 1))               # (B, T0*up, 1)
    har_source = source_module_hn_nsf(params["m_source"], cfg, f0_btc,
                                      noise_key)           # (B, 1, T0*up)

    x = run_conv(params["conv_pre"], x, x.shape[-1])
    for i in range(len(rates)):
        # F.leaky_relu(x, LRELU_SLOPE) fused into the upsampler kernel
        x = run_conv_transpose(params["upsamples"][i], x, pre_slope=LRELU_SLOPE)
        x_source = run_noise_conv(params["noise_convs"][i], har_source)
        assert x.shape == x_source.shape, (x.shape, x_source.shape)
        x = x + x_source
        xs = None
        for j in range(num_kernels):
            y = mrf_block_forward(params["mrfs"][i][j], x)
            xs = y if xs is None else xs + y
        x = xs * (1.0 / num_kernels)
    # final F.leaky_relu (default slope 0.01) and tanh fused into conv_post
    return run_conv(params["conv_post"], x, x.shape[-1],
                    pre_slope=0.01, post_op="tanh", out_dtype=jnp.float32)


# ----------------------------------------------------------------------------
# Plain-JAX references (sanity checks, bf16-rounded params / inputs)
# ----------------------------------------------------------------------------
def _conv1d_ref_from_op(op, x, out_len):
    assert op["P"] == 1
    K, dil, lpad, C_out = op["K"], op["dilation"], op["lpad"], op["C_out"]
    if op["fold"]:
        C_in = op["w"].shape[-1] // K
        w = jnp.transpose(op["w"][0].astype(jnp.float32).reshape(C_out, K, C_in),
                          (0, 2, 1))                        # (C_out, C_in, K)
    else:
        w = jnp.transpose(op["w"][0].astype(jnp.float32), (1, 2, 0))
    b = op["b"][0, :, 0]
    B, _, T = x.shape
    xb = x.astype(jnp.bfloat16).astype(jnp.float32)
    rpad = max(0, out_len + (K - 1) * dil - (T + lpad))
    xp = jnp.pad(xb, ((0, 0), (0, 0), (lpad, rpad)))
    out = jnp.broadcast_to(b[None, :, None], (B, C_out, out_len)).astype(jnp.float32)
    for k in range(K):
        out = out + jnp.einsum("oc,bct->bot", w[:, :, k],
                               xp[:, :, k * dil:k * dil + out_len])
    return out


def _conv_transpose1d_ref(x, w, b, *, stride, padding, output_padding):
    B, C_in, T = x.shape
    _, C_out, K = w.shape
    xb = x.astype(jnp.bfloat16).astype(jnp.float32)
    wb = w.astype(jnp.bfloat16).astype(jnp.float32)
    if stride > 1:
        z = jnp.zeros((B, C_in, T, stride), jnp.float32)
        z = z.at[:, :, :, 0].set(xb)
        xu = z.reshape(B, C_in, T * stride)[:, :, : (T - 1) * stride + 1]
    else:
        xu = xb
    xu = jnp.pad(xu, ((0, 0), (0, 0),
                      (K - 1 - padding, K - 1 - padding + output_padding)))
    wf = jnp.flip(jnp.transpose(wb, (1, 0, 2)), axis=2)     # (C_out, C_in, K)
    T_out = xu.shape[-1] - K + 1
    out = jnp.broadcast_to(b[None, :, None], (B, C_out, T_out)).astype(jnp.float32)
    for k in range(K):
        out = out + jnp.einsum("oc,bct->bot", wf[:, :, k], xu[:, :, k:k + T_out])
    return out


if __name__ == "__main__":
    cfg = dict(
        in_channel=16,
        upsample_initial_channel=32,
        upsample_rates=(4, 4),
        upsample_kernel_sizes=(8, 8),
        resblock_kernel_sizes=(3, 5),
        resblock_dilations=((1, 3), (1, 3)),
        sample_rate=16000,
        harmonic_num=3,
    )
    B, T0 = 2, 8
    total_up = int(np.prod(cfg["upsample_rates"]))

    root = jax.random.PRNGKey(0)
    k_param, k_x, k_f0, k_noise, k_t1, k_t2, k_t3 = jax.random.split(root, 7)
    params = init_params(cfg, k_param)

    x = jax.random.normal(k_x, (B, cfg["in_channel"], T0), jnp.float32)
    f0 = jax.random.uniform(k_f0, (B, T0), jnp.float32, 80.0, 400.0)

    # check 1: generic conv kernel (short / single-block path)
    got = run_conv(params["conv_pre"], x, T0)
    ref = _conv1d_ref_from_op(params["conv_pre"], x, T0)
    np.testing.assert_allclose(np.asarray(got.astype(jnp.float32)),
                               np.asarray(ref), atol=2e-2, rtol=2e-2)

    # check 2: polyphase ConvTranspose1d vs zero-insertion reference
    u, kk = cfg["upsample_rates"][0], cfg["upsample_kernel_sizes"][0]
    c_in, c_out = 32, 16
    sT = 1.0 / np.sqrt(c_out * kk)
    wT = jax.random.uniform(k_t1, (c_in, c_out, kk), jnp.float32, -sT, sT)
    bT = jax.random.uniform(k_t2, (c_out,), jnp.float32, -sT, sT)
    opT = _pack_convT_op(wT, bT, stride=u, padding=u // 2 + u % 2,
                         output_padding=u % 2)
    xt = jax.random.normal(k_t3, (B, c_in, T0), jnp.float32)
    gotT = run_conv_transpose(opT, xt)
    refT = _conv_transpose1d_ref(xt, wT, bT, stride=u, padding=u // 2 + u % 2,
                                 output_padding=u % 2)
    np.testing.assert_allclose(np.asarray(gotT.astype(jnp.float32)),
                               np.asarray(refT), atol=2e-2, rtol=2e-2)

    # check 3: long-sequence tiled path (halo block + multi-tile grid)
    k_w3, k_b3, k_x3 = jax.random.split(k_t1, 3)
    s3 = 1.0 / np.sqrt(32 * 5)
    op3 = _pack_conv_op(_uniform(k_w3, (16, 32, 5), s3),
                        _uniform(k_b3, (16,), s3), dilation=2, lpad=4)
    x3 = jax.random.normal(k_x3, (B, 32, 1030), jnp.float32)
    got3 = run_conv(op3, x3, 1030)
    ref3 = _conv1d_ref_from_op(op3, x3, 1030)
    np.testing.assert_allclose(np.asarray(got3.astype(jnp.float32)),
                               np.asarray(ref3), atol=2e-2, rtol=2e-2)

    # full forward pass (params / cfg closed over -> static; x, f0, key traced)
    fwd = jax.jit(functools.partial(f0_aware_hifigan_forward, params, cfg))
    out = jax.block_until_ready(fwd(x, f0, k_noise))

    assert out.shape == (B, 1, T0 * total_up), out.shape
    assert out.dtype == jnp.float32
    assert bool(jnp.all(jnp.isfinite(out)))
    print("KERNEL_OK")
</pallas_src>

<mosaic_0001>
module attributes {stable_mosaic.version = 11 : i64} {
  func.func @_conv_kernel(%arg0: i32, %arg1: i32, %arg2: memref<1x16x14xbf16, #tpu.memory_space<vmem>>, %arg3: memref<1x32x112xbf16, #tpu.memory_space<vmem>>, %arg4: memref<1x32x1xf32, #tpu.memory_space<vmem>>, %arg5: memref<1x1x32x8xbf16, #tpu.memory_space<vmem>>) attributes {dimension_semantics = [#tpu.dimension_semantics<parallel>, #tpu.dimension_semantics<parallel>], iteration_bounds = array<i64: 2, 1>, scalar_prefetch = 0 : i64, scratch_operands = 0 : i64, tpu.core_type = #tpu.core_type<tc>, window_params = [{transform_indices = @transform_0, window_bounds = array<i64: 1, 16, 14>}, {pipeline_mode = #tpu.pipeline_mode<synchronous>, transform_indices = @transform_1, window_bounds = array<i64: 1, 32, 112>}, {pipeline_mode = #tpu.pipeline_mode<synchronous>, transform_indices = @transform_2, window_bounds = array<i64: 1, 32, 1>}, {transform_indices = @transform_3, window_bounds = array<i64: 1, 1, 32, 8>}]} {
    %c0 = arith.constant 0 : index
    %c0_0 = arith.constant 0 : index
    %c0_1 = arith.constant 0 : index
    %0 = vector.load %arg2[%c0, %c0_0, %c0_1] : memref<1x16x14xbf16, #tpu.memory_space<vmem>>, vector<1x16x14xbf16>
    %1 = vector.shape_cast %0 : vector<1x16x14xbf16> to vector<16x14xbf16>
    %2 = vector.extract_strided_slice %1 {offsets = [0, 0], sizes = [16, 8], strides = [1, 1]} : vector<16x14xbf16> to vector<16x8xbf16>
    %3 = vector.extract_strided_slice %1 {offsets = [0, 1], sizes = [16, 8], strides = [1, 1]} : vector<16x14xbf16> to vector<16x8xbf16>
    %4 = vector.extract_strided_slice %1 {offsets = [0, 2], sizes = [16, 8], strides = [1, 1]} : vector<16x14xbf16> to vector<16x8xbf16>
    %5 = vector.extract_strided_slice %1 {offsets = [0, 3], sizes = [16, 8], strides = [1, 1]} : vector<16x14xbf16> to vector<16x8xbf16>
    %6 = vector.extract_strided_slice %1 {offsets = [0, 4], sizes = [16, 8], strides = [1, 1]} : vector<16x14xbf16> to vector<16x8xbf16>
    %7 = vector.extract_strided_slice %1 {offsets = [0, 5], sizes = [16, 8], strides = [1, 1]} : vector<16x14xbf16> to vector<16x8xbf16>
    %8 = vector.extract_strided_slice %1 {offsets = [0, 6], sizes = [16, 8], strides = [1, 1]} : vector<16x14xbf16> to vector<16x8xbf16>
    %9 = tpu.concatenate %2, %3, %4, %5, %6, %7, %8 in 0 : vector<16x8xbf16>, vector<16x8xbf16>, vector<16x8xbf16>, vector<16x8xbf16>, vector<16x8xbf16>, vector<16x8xbf16>, vector<16x8xbf16> -> vector<112x8xbf16>
    %c0_2 = arith.constant 0 : index
    %c0_3 = arith.constant 0 : index
    %c0_4 = arith.constant 0 : index
    %10 = vector.load %arg3[%c0_2, %c0_3, %c0_4] : memref<1x32x112xbf16, #tpu.memory_space<vmem>>, vector<1x32x112xbf16>
    %11 = vector.shape_cast %10 : vector<1x32x112xbf16> to vector<32x112xbf16>
    %cst = arith.constant dense<0.000000e+00> : vector<32x8xf32>
    %12 = tpu.matmul %11, %9, %cst {dimension_numbers = #tpu.dot_dimension_numbers<[1], [0], [0], [1], [0, 0, 1, 1], [], []>} : vector<32x112xbf16>, vector<112x8xbf16>, vector<32x8xf32> -> vector<32x8xf32>
    %c0_5 = arith.constant 0 : index
    %c0_6 = arith.constant 0 : index
    %c0_7 = arith.constant 0 : index
    %13 = vector.load %arg4[%c0_5, %c0_6, %c0_7] : memref<1x32x1xf32, #tpu.memory_space<vmem>>, vector<1x32x1xf32>
    %14 = vector.shape_cast %13 : vector<1x32x1xf32> to vector<32x1xf32>
    %15 = vector.broadcast %14 : vector<32x1xf32> to vector<32x8xf32>
    %16 = arith.addf %12, %15 : vector<32x8xf32>
    %17 = arith.truncf %16 : vector<32x8xf32> to vector<32x8xbf16>
    %c0_8 = arith.constant 0 : index
    %c0_9 = arith.constant 0 : index
    %c0_10 = arith.constant 0 : index
    %c0_11 = arith.constant 0 : index
    %18 = vector.load %arg5[%c0_8, %c0_9, %c0_10, %c0_11] : memref<1x1x32x8xbf16, #tpu.memory_space<vmem>>, vector<1x1x32x8xbf16>
    %19 = vector.shape_cast %18 : vector<1x1x32x8xbf16> to vector<32x8xbf16>
    %20 = vector.shape_cast %17 : vector<32x8xbf16> to vector<1x1x32x8xbf16>
    tpu.vector_store %arg5[%c0_8, %c0_9, %c0_10, %c0_11], %20 {strides = array<i32>} : memref<1x1x32x8xbf16, #tpu.memory_space<vmem>>, vector<1x1x32x8xbf16>,
    return
  }
  func.func @transform_0(%arg0: i32, %arg1: i32) -> (i32, i32, i32) {
    %c0_i32 = arith.constant 0 : i32
    %c0_i32_0 = arith.constant 0 : i32
    return %arg0, %c0_i32, %arg1 : i32, i32, i32
  }
  func.func @transform_1(%arg0: i32, %arg1: i32) -> (i32, i32, i32) {
    %c0_i32 = arith.constant 0 : i32
    %c0_i32_0 = arith.constant 0 : i32
    %c0_i32_1 = arith.constant 0 : i32
    %c0_i32_2 = arith.constant 0 : i32
    return %c0_i32, %c0_i32_0, %c0_i32_1 : i32, i32, i32
  }
  func.func @transform_2(%arg0: i32, %arg1: i32) -> (i32, i32, i32) {
    %c0_i32 = arith.constant 0 : i32
    %c0_i32_0 = arith.constant 0 : i32
    %c0_i32_1 = arith.constant 0 : i32
    %c0_i32_2 = arith.constant 0 : i32
    return %c0_i32, %c0_i32_0, %c0_i32_1 : i32, i32, i32
  }
  func.func @transform_3(%arg0: i32, %arg1: i32) -> (i32, i32, i32, i32) {
    %c0_i32 = arith.constant 0 : i32
    %c0_i32_0 = arith.constant 0 : i32
    %c0_i32_1 = arith.constant 0 : i32
    return %arg0, %c0_i32, %c0_i32_0, %arg1 : i32, i32, i32, i32
  }
}

</mosaic_0001>

<bundles_post_ra>
// kernel: tpu_custom_call.1
= control target key start
LH: loop header
LB: loop body
LE: loop exit
PB: predicated region body
PF: predicated region fallthrough
CT: control target
= control target key end

     0   :  { %s567_s12 = smov 0   ;;  %s569_s13 = smov 0   ;;  %s624_s0 = inlined_call_operand.vmem [shape: bf16[2,16,14], index: 0, kind: input, shape index: {}]   ;;  %s625_s1 = inlined_call_operand.vmem [shape: bf16[1,32,112], index: 1, kind: input, shape index: {}]   ;;  %s626_s2 = inlined_call_operand.vmem [shape: f32[1,32,1], index: 2, kind: input, shape index: {}]   ;;  %s627_s3 = inlined_call_operand.vmem [shape: bf16[2,1,32,8], index: 3, kind: output, shape index: {}]  }
   0x1   :  { %s571_s14 = smov 0  }
   0x2 LB: > { %s25_s15 = sadd.s32 1, %s534_s13  ;;  %p431_p0 = scmp.ge.s32.totalorder %s538_s14, 1  ;;  %s538_s14 = sphi %s571_s14, %s13_s14   ;;  %s534_s13 = sphi %s569_s13, %s629_s13   ;;  %s530_s12 = sphi %s567_s12, %s628_s12  }
   0x3   : > { %p27_p1 = scmp.ge.s32.totalorder %s25_s15, 2  ;;  %p156_p2 = scmp.lt.s32.totalorder %s538_s14, 3 }
   0x5   : > { %s631_s15 = smov (%p27_p1, %s25_s15), 0  ;;  %p157_p3 = pnand %p431_p0, %p156_p2 }
   0x6   : > { %p186_p4 = scmp.lt.s32.totalorder (!%p157_p3), %s530_s12, 1  ;;  %s540_s20 = smov (!%p157_p3), 127   ;;  %v514_v1 = vld [vmem:[%s625_s1] sm:$0xff] (!%p157_p3)   ;;  %vm267_vm0 = vcmask (!%p157_p3), 916480   ;;  %v234_v2 = vld [vmem:[%s626_s2 + $0x8] sm:$0xff] (!%p157_p3)  ;;  %v546_v4 = vmov (!%p157_p3), 0  }
   0x7   : > { %160 = sbr.rel (%p157_p3) target bundleno = 377 (0x179), region = 32  ;;  %s541_s21 = smov (!%p157_p3), 125   ;;  %476 = vmatprep.mubr.msk.bf16.mxu0 (!%p157_p3), %vm267_vm0, %v514_v1  ;;  %v233_v3 = vld [vmem:[%s626_s2] sm:$0xff] (!%p157_p3)  ;;  %512 = vset.pattern.permute.xlu1 (!%p157_p3), %v546_v4  ;;  %v235_v5 = vld [vmem:[%s626_s2 + $0x10] sm:$0xff] (!%p157_p3)  ;;  %v236_v6 = vld [vmem:[%s626_s2 + $0x18] sm:$0xff] (!%p157_p3)  ;;  %vm339_vm1 = vcmask (!%p157_p3), 60416  }
   0x8   : > { %s542_s22 = smov (!%p157_p3), 126   ;;  %s543_s23 = smov (!%p157_p3), 124   ;;  %511 = vset.pattern.permute.xlu0 (!%p157_p3), %v546_v4  ;;  %v515_v13 = vld [vmem:[%s625_s1 + $0x8] sm:$0xff] (!%p157_p3)  }
   0x9   : > { %s544_s24 = smov (!%p157_p3), 123   ;;  %s545_s25 = smov (!%p157_p3), 122  }
   0xe   : > { %s633_s12 = smov (!%p186_p4, %s530_s12), 1 }
   0xf   : > { %s447_s16 = sshll.u32 %s633_s12, 3  ;;  %s448_s11 = sshll.u32 %s633_s12, 4 }
  0x10   : > { %s193_s19 = scalar_lea.vmem %s624_s0, %s447_s16  ;;  %s201_s18 = scalar_lea.vmem %s627_s3, %s448_s11 }
  0x11   : > { %v513_v0 = vld [vmem:[%s193_s19] sm:$0xff]  }
  0x12   : > { %211 = vrot.lane.b32.xlu0 %v513_v0, %s540_s20  ;;  %217 = vrot.lane.b32.xlu1 %v513_v0, %s541_s21 }
  0x13   : > { %462 = vmatprep.subr.bf16.mxu0 %v513_v0 }
  0x14   : > { %463 = vmatpush3.bf16.msra.mxu0 %v513_v0 }
  0x16   : > { %214 = vrot.lane.b32.xlu0 %v513_v0, %s542_s22  ;;  %220 = vrot.lane.b32.xlu1 %v513_v0, %s543_s23 }
  0x1a   : > { %223 = vrot.lane.b32.xlu0 %v513_v0, %s544_s24  ;;  %226 = vrot.lane.b32.xlu1 %v513_v0, %s545_s25 }
  0x1e   : > { %244 = vperm.xlu1 %512, %v234_v2   ;;  %239 = vperm.xlu0 %511, %v233_v3  }
  0x22   : > { %249 = vperm.xlu1 %512, %v235_v5   ;;  %254 = vperm.xlu0 %511, %v236_v6  }
  0x84   : > { %v212_v7 = vpop.permute.xlu0 %211  ;;  %v218_v8 = vpop.permute.xlu1 %217 }
  0x85   : > { %464 = vmatprep.subr.bf16.mxu0 %v212_v7 }
  0x86   : > { %465 = vmatpush3.bf16.msra.mxu0 %v212_v7 }
  0x88   : > { %v215_v9 = vpop.permute.xlu0 %214  ;;  %v221_v10 = vpop.permute.xlu1 %220 }
  0x89   : > { %466 = vmatprep.subr.bf16.mxu0 %v215_v9 }
  0x8a   : > { %467 = vmatpush3.bf16.msra.mxu0 %v215_v9 }
  0x8b   : > { %468 = vmatprep.subr.bf16.mxu0 %v218_v8 }
  0x8c   : > { %v224_v11 = vpop.permute.xlu0 %223  ;;  %v227_v12 = vpop.permute.xlu1 %226 }
  0x8e   : > { %469 = vmatpush3.bf16.msra.mxu0 %v218_v8 }
  0x8f   : > { %470 = vmatprep.subr.bf16.mxu0 %v221_v10 }
  0x92   : > { %471 = vmatpush3.bf16.msra.mxu0 %v221_v10 }
  0x93   : > { %472 = vmatprep.subr.bf16.mxu0 %v224_v11 }
  0x96   : > { %473 = vmatpush3.bf16.msra.mxu0 %v224_v11 }
  0x97   : > { %474 = vmatprep.subr.bf16.mxu0 %v227_v12 }
  0x9a   : > { %475 = vmatpush3.bf16.msra.mxu0 %v227_v12 }
  0x9d   : > { %477 = vmatmul.mubr.msk.bf16.vlgmr.msra.gmra.mrb[0].mxu0 %vm267_vm0, %v515_v13  ;;  %v245_v14 = vpop.permute.xlu1 %244  ;;  %v240_v15 = vpop.permute.xlu0 %239 }
  0xa1   : > { %v250_v16 = vpop.permute.xlu1 %249  ;;  %v255_v20 = vpop.permute.xlu0 %254 }
 0x170   : > { %v478_v17 = vpop.f32.mrb[0].mxu0 }
 0x171   : > { %v317_v18 = vadd.f32 %v478_v17, %v250_v16  ;;  %v308_v19 = vpop.f32.mrb[1].mxu0 }
 0x172   : > { %v309_v21 = vadd.f32 %v308_v19, %v240_v15  ;;  %v479_v22 = vpop.f32.mrb[2].mxu0 }
 0x173   : > { %v451_v23 = vpack.c.bf16 %v317_v18, %v317_v18  ;;  %v320_v24 = vadd.f32 %v479_v22, %v255_v20  ;;  %v311_v25 = vpop.f32.mrb[3].mxu0 }
 0x174   : > { %v449_v26 = vpack.c.bf16 %v309_v21, %v309_v21  ;;  %v312_v27 = vadd.f32 %v311_v25, %v245_v14 }
 0x175   : > { %342 = vst.msk [vmem:[%s201_s18 + $0x8] sm:$0xf] %vm339_vm1, %v451_v23  ;;  %v452_v28 = vpack.c.bf16 %v320_v24, %v320_v24 }
 0x176   : > { %340 = vst.msk [vmem:[%s201_s18] sm:$0xf] %vm339_vm1, %v449_v26  ;;  %v450_v29 = vpack.c.bf16 %v312_v27, %v312_v27 }
 0x177   : > { %343 = vst.msk [vmem:[%s201_s18 + $0xc] sm:$0xf] %vm339_vm1, %v452_v28 }
 0x178   : > { %341 = vst.msk [vmem:[%s201_s18 + $0x4] sm:$0xf] %vm339_vm1, %v450_v29 }
 0x179 PF: > { %s13_s14 = sadd.s32 1, %s538_s14   ;;  %s628_s12 = smov %s534_s13 }
 0x17a   : > { %p10_p5 = scmp.ge.s32.totalorder %s13_s14, 4   ;;  %s629_s13 = smov %s631_s15 }
 0x17c   :  { %12 = sbr.rel (!%p10_p5) target bundleno = 2 (0x2), region = 62 }

</bundles_post_ra>
